<compile_context>
chip_gen: v7x
topology: tpu7x:2x2x1
jax: 0.10.0
libtpu: 0.0.40
codegen_flags: <defaults>
</compile_context>

<pallas_src>
import functools

import jax
import jax.numpy as jnp
from jax.experimental import pallas as pl
from jax.experimental.pallas import tpu as pltpu

BIAS = 1e-12
TARGET_BIAS = 1e-6

_NUM_CORE_SPLITS = 2            # leading "parallel" grid axis -> uses both TCs on v7x, harmless on v5e/v6e
_LANE = 512                     # lane-dense slab width (multiple of 128) for the scalar-mean path
_TILE_BYTES = 2 * 1024 * 1024   # per-input per-tile VMEM budget (x2 inputs x2 pipeline buffers = 8 MiB)
_MAX_TILE_ROWS = 4096
_VMEM_LIMIT = 32 * 1024 * 1024  # safe on v5e (128 MiB), v6e (128 MiB) and v7x (64 MiB)


def _round_up(x, m):
    return (x + m - 1) // m * m


def _pick_row_tile(num_rows, lane_width):
    """Largest legal row tile: multiple of 8 within the VMEM budget, or the full extent."""
    tr = _TILE_BYTES // (lane_width * 4)
    tr = max(8, (tr // 8) * 8)
    tr = min(tr, _MAX_TILE_ROWS)
    if num_rows <= tr:
        return num_rows            # full extent is always a legal block dim
    return tr


def _mean_sum_kernel(pred_ref, tgt_ref, acc_ref, *, tile_rows, lane, valid_elems):
    """Scalar-mean mode: per-core, per-lane partial sums (final lane reduce in the wrapper)."""
    c = pl.program_id(0)
    i = pl.program_id(1)
    steps = pl.num_programs(1)

    @pl.when(i == 0)
    def _():
        acc_ref[...] = jnp.zeros_like(acc_ref)

    # Global flat-element mask: handles both the lane-padding tail and ragged row tiles
    # (including the clamped "phantom" tiles of the second core split).
    tile_idx = c * steps + i                                   # unclamped logical tile id
    row0 = tile_idx * tile_rows
    rows = jax.lax.broadcasted_iota(jnp.int32, (tile_rows, lane), 0)
    cols = jax.lax.broadcasted_iota(jnp.int32, (tile_rows, lane), 1)
    mask = (row0 + rows) * lane + cols < valid_elems

    o = jnp.where(mask, pred_ref[...].astype(jnp.float32) + jnp.float32(BIAS), 1.0)
    t = jnp.where(mask, tgt_ref[...].astype(jnp.float32) + jnp.float32(TARGET_BIAS), 0.0)
    # Exact divide kept for accuracy (pl.reciprocal(approx=True) would trade precision for EUP slots).
    loss = t / o + jnp.log(o)                                  # masked elements: 0/1 + log(1) == 0
    acc_ref[...] += jnp.sum(loss, axis=0, keepdims=True)[None]


def _per_neuron_sum_kernel(pred_ref, tgt_ref, acc_ref, *, tile_rows, n_cols, valid_rows):
    """Per-neuron mode: per-core, per-column partial sums (neurons stay on the lane axis)."""
    c = pl.program_id(0)
    i = pl.program_id(1)
    steps = pl.num_programs(1)

    @pl.when(i == 0)
    def _():
        acc_ref[...] = jnp.zeros_like(acc_ref)

    row0 = (c * steps + i) * tile_rows
    rows = jax.lax.broadcasted_iota(jnp.int32, (tile_rows, n_cols), 0)
    mask = (row0 + rows) < valid_rows

    o = jnp.where(mask, pred_ref[...].astype(jnp.float32) + jnp.float32(BIAS), 1.0)
    t = jnp.where(mask, tgt_ref[...].astype(jnp.float32) + jnp.float32(TARGET_BIAS), 0.0)
    loss = t / o + jnp.log(o)
    acc_ref[...] += jnp.sum(loss, axis=0, keepdims=True)[None]


def _exponential_loss_mean(output, target):
    total = output.size
    flat_o = output.reshape(-1)
    flat_t = target.reshape(-1)
    padded = _round_up(total, _LANE)
    if padded != total:
        pad = padded - total
        flat_o = jnp.concatenate([flat_o, jnp.ones((pad,), flat_o.dtype)])
        flat_t = jnp.concatenate([flat_t, jnp.zeros((pad,), flat_t.dtype)])
    rows = padded // _LANE
    o2d = flat_o.reshape(rows, _LANE)
    t2d = flat_t.reshape(rows, _LANE)

    tr = _pick_row_tile(rows, _LANE)
    n_tiles = pl.cdiv(rows, tr)
    steps = pl.cdiv(n_tiles, _NUM_CORE_SPLITS)

    def in_map(c, i):
        # Clamp so the DMA never walks past the array; the in-kernel mask zeroes re-read tiles.
        return (jnp.minimum(c * steps + i, n_tiles - 1), 0)

    in_spec = pl.BlockSpec((tr, _LANE), in_map)
    kernel = functools.partial(_mean_sum_kernel, tile_rows=tr, lane=_LANE, valid_elems=total)

    partials = pl.pallas_call(
        kernel,
        out_shape=jax.ShapeDtypeStruct((_NUM_CORE_SPLITS, 1, _LANE), jnp.float32),
        grid_spec=pl.GridSpec(
            grid=(_NUM_CORE_SPLITS, steps),
            in_specs=[in_spec, in_spec],
            out_specs=pl.BlockSpec((1, 1, _LANE), lambda c, i: (c, 0, 0)),
        ),
        compiler_params=pltpu.CompilerParams(
            dimension_semantics=("parallel", "arbitrary"),
            vmem_limit_bytes=_VMEM_LIMIT),
    )(o2d, t2d)
    return jnp.sum(partials) / jnp.float32(total)


def _exponential_loss_per_neuron(output, target):
    n = output.shape[-1]
    o2d = output.reshape(-1, n)
    t2d = target.reshape(-1, n)
    r = o2d.shape[0]

    tr = _pick_row_tile(r, n)
    n_tiles = pl.cdiv(r, tr)
    steps = pl.cdiv(n_tiles, _NUM_CORE_SPLITS)

    def in_map(c, i):
        return (jnp.minimum(c * steps + i, n_tiles - 1), 0)

    in_spec = pl.BlockSpec((tr, n), in_map)
    kernel = functools.partial(_per_neuron_sum_kernel, tile_rows=tr, n_cols=n, valid_rows=r)

    partials = pl.pallas_call(
        kernel,
        out_shape=jax.ShapeDtypeStruct((_NUM_CORE_SPLITS, 1, n), jnp.float32),
        grid_spec=pl.GridSpec(
            grid=(_NUM_CORE_SPLITS, steps),
            in_specs=[in_spec, in_spec],
            out_specs=pl.BlockSpec((1, 1, n), lambda c, i: (c, 0, 0)),
        ),
        compiler_params=pltpu.CompilerParams(
            dimension_semantics=("parallel", "arbitrary"),
            vmem_limit_bytes=_VMEM_LIMIT),
    )(o2d, t2d)
    return jnp.sum(partials, axis=(0, 1)) / jnp.float32(r)


def exponential_loss(output, target, *, per_neuron=False):
    assert output.shape == target.shape
    if per_neuron:
        return _exponential_loss_per_neuron(output, target)
    return _exponential_loss_mean(output, target)


def _reference(output, target, per_neuron=False):
    o = output.astype(jnp.float32) + BIAS
    t = target.astype(jnp.float32) + TARGET_BIAS
    loss = t / o + jnp.log(o)
    if not per_neuron:
        return loss.mean()
    return loss.reshape(-1, loss.shape[-1]).mean(axis=0)


if __name__ == "__main__":
    key = jax.random.PRNGKey(0)

    # Case 1: small, nicely shaped (batch, neurons).
    k1, k2 = jax.random.split(key)
    out1 = jax.random.uniform(k1, (16, 32), jnp.float32, 0.1, 2.0)
    tgt1 = jax.random.uniform(k2, (16, 32), jnp.float32, 0.0, 2.0)

    loss_scalar = jax.block_until_ready(exponential_loss(out1, tgt1, per_neuron=False))
    loss_pn = jax.block_until_ready(exponential_loss(out1, tgt1, per_neuron=True))
    assert jnp.allclose(loss_scalar, _reference(out1, tgt1, False), rtol=1e-5, atol=1e-5)
    assert jnp.allclose(loss_pn, _reference(out1, tgt1, True), rtol=1e-5, atol=1e-5)

    # Case 2: ragged shapes (exercises lane padding + row masking paths).
    k3, k4 = jax.random.split(k1)
    out2 = jax.random.uniform(k3, (10, 7), jnp.float32, 0.1, 2.0)
    tgt2 = jax.random.uniform(k4, (10, 7), jnp.float32, 0.0, 2.0)

    loss_scalar2 = jax.block_until_ready(exponential_loss(out2, tgt2, per_neuron=False))
    loss_pn2 = jax.block_until_ready(exponential_loss(out2, tgt2, per_neuron=True))
    assert jnp.allclose(loss_scalar2, _reference(out2, tgt2, False), rtol=1e-5, atol=1e-5)
    assert jnp.allclose(loss_pn2, _reference(out2, tgt2, True), rtol=1e-5, atol=1e-5)

    print("KERNEL_OK")
</pallas_src>

<mosaic_0001>
module attributes {stable_mosaic.version = 11 : i64} {
  func.func @_mean_sum_kernel(%arg0: i32, %arg1: i32, %arg2: memref<1x512xf32, #tpu.memory_space<vmem>>, %arg3: memref<1x512xf32, #tpu.memory_space<vmem>>, %arg4: memref<1x1x512xf32, #tpu.memory_space<vmem>>) attributes {dimension_semantics = [#tpu.dimension_semantics<parallel>, #tpu.dimension_semantics<arbitrary>], iteration_bounds = array<i64: 2, 1>, scalar_prefetch = 0 : i64, scratch_operands = 0 : i64, tpu.core_type = #tpu.core_type<tc>, window_params = [{transform_indices = @transform_0, window_bounds = array<i64: 1, 512>}, {transform_indices = @transform_1, window_bounds = array<i64: 1, 512>}, {transform_indices = @transform_2, window_bounds = array<i64: 1, 1, 512>}]} {
    %c0_i32 = arith.constant 0 : i32
    %0 = arith.cmpi eq, %arg1, %c0_i32 : i32
    %1 = arith.extui %0 : i1 to i32
    %c0_i32_0 = arith.constant 0 : i32
    %2 = arith.cmpi ne, %1, %c0_i32_0 : i32
    scf.if %2 {
      %cst_16 = arith.constant 0.000000e+00 : f32
      %34 = vector.broadcast %cst_16 : f32 to vector<1x1x512xf32>
      %c0_17 = arith.constant 0 : index
      %c0_18 = arith.constant 0 : index
      %c0_19 = arith.constant 0 : index
      %35 = vector.load %arg4[%c0_17, %c0_18, %c0_19] : memref<1x1x512xf32, #tpu.memory_space<vmem>>, vector<1x1x512xf32>
      tpu.vector_store %arg4[%c0_17, %c0_18, %c0_19], %34 {strides = array<i32>} : memref<1x1x512xf32, #tpu.memory_space<vmem>>, vector<1x1x512xf32>,
    } else {
    }
    %c1_i32 = arith.constant 1 : i32
    %3 = arith.muli %arg0, %c1_i32 : i32
    %4 = arith.addi %3, %arg1 : i32
    %c1_i32_1 = arith.constant 1 : i32
    %5 = arith.muli %4, %c1_i32_1 : i32
    %6 = tpu.iota {dimensions = array<i32: 0>} : vector<1x512xi32>
    %7 = tpu.iota {dimensions = array<i32: 1>} : vector<1x512xi32>
    %8 = vector.broadcast %5 : i32 to vector<1x512xi32>
    %9 = arith.addi %8, %6 : vector<1x512xi32>
    %c512_i32 = arith.constant 512 : i32
    %10 = vector.broadcast %c512_i32 : i32 to vector<1x512xi32>
    %11 = arith.muli %9, %10 : vector<1x512xi32>
    %12 = arith.addi %11, %7 : vector<1x512xi32>
    %c512_i32_2 = arith.constant 512 : i32
    %13 = vector.broadcast %c512_i32_2 : i32 to vector<1x512xi32>
    %14 = arith.cmpi slt, %12, %13 : vector<1x512xi32>
    %c0 = arith.constant 0 : index
    %c0_3 = arith.constant 0 : index
    %15 = vector.load %arg2[%c0, %c0_3] : memref<1x512xf32, #tpu.memory_space<vmem>>, vector<1x512xf32>
    %cst = arith.constant 9.99999996E-13 : f32
    %16 = vector.broadcast %cst : f32 to vector<1x512xf32>
    %17 = arith.addf %15, %16 : vector<1x512xf32>
    %cst_4 = arith.constant 1.000000e+00 : f32
    %18 = vector.broadcast %cst_4 : f32 to vector<1x512xf32>
    %19 = arith.select %14, %17, %18 : vector<1x512xi1>, vector<1x512xf32>
    %c0_5 = arith.constant 0 : index
    %c0_6 = arith.constant 0 : index
    %20 = vector.load %arg3[%c0_5, %c0_6] : memref<1x512xf32, #tpu.memory_space<vmem>>, vector<1x512xf32>
    %cst_7 = arith.constant 9.99999997E-7 : f32
    %21 = vector.broadcast %cst_7 : f32 to vector<1x512xf32>
    %22 = arith.addf %20, %21 : vector<1x512xf32>
    %cst_8 = arith.constant 0.000000e+00 : f32
    %23 = vector.broadcast %cst_8 : f32 to vector<1x512xf32>
    %24 = arith.select %14, %22, %23 : vector<1x512xi1>, vector<1x512xf32>
    %25 = arith.divf %24, %19 : vector<1x512xf32>
    %26 = math.log %19 : vector<1x512xf32>
    %27 = arith.addf %25, %26 : vector<1x512xf32>
    %c0_9 = arith.constant 0 : index
    %c0_10 = arith.constant 0 : index
    %c0_11 = arith.constant 0 : index
    %28 = vector.load %arg4[%c0_9, %c0_10, %c0_11] : memref<1x1x512xf32, #tpu.memory_space<vmem>>, vector<1x1x512xf32>
    %cst_12 = arith.constant dense<0.000000e+00> : vector<512xf32>
    %29 = vector.multi_reduction <add>, %27, %cst_12 [0] : vector<1x512xf32> to vector<512xf32>
    %30 = vector.shape_cast %29 : vector<512xf32> to vector<1x512xf32>
    %31 = vector.shape_cast %30 : vector<1x512xf32> to vector<1x1x512xf32>
    %32 = arith.addf %28, %31 : vector<1x1x512xf32>
    %c0_13 = arith.constant 0 : index
    %c0_14 = arith.constant 0 : index
    %c0_15 = arith.constant 0 : index
    %33 = vector.load %arg4[%c0_13, %c0_14, %c0_15] : memref<1x1x512xf32, #tpu.memory_space<vmem>>, vector<1x1x512xf32>
    tpu.vector_store %arg4[%c0_13, %c0_14, %c0_15], %32 {strides = array<i32>} : memref<1x1x512xf32, #tpu.memory_space<vmem>>, vector<1x1x512xf32>,
    return
  }
  func.func @transform_0(%arg0: i32, %arg1: i32) -> (i32, i32) {
    %c1_i32 = arith.constant 1 : i32
    %0 = arith.muli %arg0, %c1_i32 : i32
    %1 = arith.addi %0, %arg1 : i32
    %c0_i32 = arith.constant 0 : i32
    %2 = arith.minsi %1, %c0_i32 : i32
    %c0_i32_0 = arith.constant 0 : i32
    %c0_i32_1 = arith.constant 0 : i32
    return %2, %c0_i32_0 : i32, i32
  }
  func.func @transform_1(%arg0: i32, %arg1: i32) -> (i32, i32) {
    %c1_i32 = arith.constant 1 : i32
    %0 = arith.muli %arg0, %c1_i32 : i32
    %1 = arith.addi %0, %arg1 : i32
    %c0_i32 = arith.constant 0 : i32
    %2 = arith.minsi %1, %c0_i32 : i32
    %c0_i32_0 = arith.constant 0 : i32
    %c0_i32_1 = arith.constant 0 : i32
    return %2, %c0_i32_0 : i32, i32
  }
  func.func @transform_2(%arg0: i32, %arg1: i32) -> (i32, i32, i32) {
    %c0_i32 = arith.constant 0 : i32
    %c0_i32_0 = arith.constant 0 : i32
    %c0_i32_1 = arith.constant 0 : i32
    return %arg0, %c0_i32, %c0_i32_0 : i32, i32, i32
  }
}

</mosaic_0001>

<bundles_post_ra>
// kernel: tpu_custom_call.1
= control target key start
LH: loop header
LB: loop body
LE: loop exit
PB: predicated region body
PF: predicated region fallthrough
CT: control target
= control target key end

     0   :  { %7 = vsyncpa [#allocation3], 0  ;;  %s1051_s0 = inlined_call_operand.hbm [shape: f32[1,512], index: 0, kind: input, shape index: {}]   ;;  %s1052_s1 = inlined_call_operand.hbm [shape: f32[1,512], index: 1, kind: input, shape index: {}]   ;;  %s1053_s2 = inlined_call_operand.hbm [shape: f32[2,1,512], index: 2, kind: output, shape index: {}]  }
   0x1   :  { %9 = vsyncpa [#allocation3 + $0x1], 0 }
   0x2   :  { %10 = vsyncpa [#allocation6], 0 }
   0x3   :  { %12 = vsyncpa [#allocation6 + $0x1], 0 }
   0x4   :  { %13 = vsyncpa [#allocation4], 0 }
   0x5   :  { %15 = vsyncpa [#allocation4 + $0x1], 0  ;;  %s812_s9 = smov 0   ;;  %s814_s10 = smov 0  }
   0x6   :  { %s816_s11 = smov 0   ;;  %s818_s12 = smov 0  }
   0x7   :  { %s820_s13 = smov 0   ;;  %s822_s14 = smov 0  }
   0x8   :  { %s824_s15 = smov 0   ;;  %s826_s16 = smov 0  }
   0x9 LB: > { %s492_s17 = sadd.s32 4294967295, %s790_s16   ;;  %s493_s18 = sadd.s32 4294967294, %s790_s16   ;;  %s790_s16 = sphi %s826_s16, %s21_s16   ;;  %s786_s15 = sphi %s824_s15, %s1076_s15   ;;  %s782_s14 = sphi %s822_s14, %s1075_s14   ;;  %s778_s13 = sphi %s820_s13, %s1041_s13   ;;  %s774_s12 = sphi %s818_s12, %s1074_s12   ;;  %s770_s11 = sphi %s816_s11, %s1073_s11   ;;  %s766_s10 = sphi %s814_s10, %s1072_s10   ;;  %s762_s9 = sphi %s812_s9, %s1071_s9  }
   0xa   : > { %s33_s19 = sadd.s32 1, %s786_s15  ;;  %p759_p1 = scmp.ne.s32.totalorder %s778_s13, 0 }
   0xb   : > { %p35_p0 = scmp.ge.s32.totalorder %s33_s19, 2  ;;  %p54_p2 = scmp.eq.s32.totalorder %s790_s16, 0 }
   0xc   : > { %p59_p3 = scmp.ne.s32.totalorder %s778_s13, %s774_s12  ;;  %p60_p5 = scmp.eq.s32.totalorder %s492_s17, 0 }
   0xd   : > { %s1078_s19 = smov (%p35_p0, %s33_s19), 0  ;;  %p858_p4 = por %p759_p1, %p54_p2 }
   0xe   : > { %p862_p6 = por %p60_p5, %p59_p3  ;;  %s101_s22 = ssub.s32 %s786_s15, %s1078_s19 }
   0xf   : > { %p102_p7 = scmp.eq.s32.totalorder %s101_s22, 0  ;;  %s104_s23 = sadd.s32 1, %s770_s11 }
  0x10   : > { %s1057_s21 = scalar_select %p862_p6, 1, 0 }
  0x11   : > { %s870_s24 = scalar_select %p102_p7, %s770_s11, %s104_s23  }
  0x12   : > { %p114_p8 = scmp.ne.s32.totalorder %s770_s11, %s766_s10  ;;  %p115_p9 = scmp.eq.s32.totalorder %s492_s17, 1 }
  0x13   : > { %p120_p10 = scmp.ne.s32.totalorder %s766_s10, %s762_s9  ;;  %p121_p11 = scmp.eq.s32.totalorder %s493_s18, 1 }
  0x14   : > { %p876_p12 = por %p115_p9, %p114_p8  ;;  %p531_p1 = scmp.lt.s32.totalorder %s790_s16, 2 }
  0x15   : > { %p881_p0 = por %p121_p11, %p120_p10  ;;  %s792_s27 = smov [#allocation2]  }
  0x16   : > { %s1058_s25 = scalar_select %p876_p12, 1, 0 }
  0x17   : > { %s1059_s26 = scalar_select %p881_p0, 1, 0 }
  0x18   : > { %s156_s28 = sshll.u32 %s792_s27, 4  ;;  %p888_p2 = pnand %p531_p1, %p858_p4  ;;  %s157_s28 = int_to_ptr.vmem [resolvable:$true] %s156_s28 }
  0x19   : > { %s623_s4 = scalar_lea.hbm %s1051_s0, 64 }
  0x1a   : > { %p624_p7 = scmp.ne.s32.totalorder %s1051_s0, %s623_s4  ;;  %p625_p8 = pneg %p888_p2 }
  0x1b   : > { %p630_p10 = scmp.lt.u32.totalorder %s623_s4, %s623_s4  ;;  %p632_p11 = scmp.lt.u32.totalorder %s623_s4, %s1051_s0 }
  0x1c   : > { %p626_p4 = pnand %p625_p8, %p624_p7 }
  0x1d   : > { %p633_p1 = por %p632_p11, %p630_p10 }
  0x1e   : > { %p627_p9 = pneg %p626_p4 }
  0x20   : > { %p634_p13 = pnand %p633_p1, %p627_p9 }
  0x22   : > { %637 = shalt.err (!%p634_p13)
}
  0x23   : > { %s638_s12 = scalar_lea.vmem %s157_s28, 64  ;;  %s645_s17 = scalar_lea.vmem %s157_s28, 128 }
  0x24   : > { %p639_p3 = scmp.ne.s32.totalorder %s157_s28, %s638_s12  ;;  %p646_p12 = scmp.lt.s32.totalorder %s157_s28, %s157_s28 }
  0x25   : > { %p647_p6 = scmp.lt.s32.totalorder %s645_s17, %s638_s12 }
  0x26   : > { %p641_p5 = pnand %p639_p3, %p625_p8 }
  0x27   : > { %p648_p7 = por %p647_p6, %p646_p12 }
  0x28   : > { %p642_p0 = pneg %p641_p5 }
  0x2a   : > { %p649_p4 = pnand %p648_p7, %p642_p0 }
  0x2c   : > { %652 = shalt.err (!%p649_p4)
}
  0x2d   : > { %523 = dma.hbm_to_vmem [thread:$0]  (!%p888_p2), %s1051_s0, 64, %s157_s28, [#allocation3]  }
  0x2e   : > { %p1061_p13 = scmp.lt.s32.totalorder %s790_s16, 3  ;;  %p1062_p9 = scmp.ge.s32.totalorder %s790_s16, 1 }
  0x2f   : > { %s793_s23 = smov [#allocation5]   ;;  %s653_s4 = scalar_lea.hbm %s1052_s1, 64 }
  0x30   : > { %p920_p10 = pnand %p1062_p9, %p1061_p13  ;;  %s178_s27 = sshll.u32 %s793_s23, 4  ;;  %s179_s27 = int_to_ptr.vmem [resolvable:$true] %s178_s27 }
  0x31   : > { %p654_p6 = scmp.ne.s32.totalorder %s1052_s1, %s653_s4  ;;  %p660_p3 = scmp.lt.u32.totalorder %s653_s4, %s653_s4 }
  0x32   : > { %s1063_s22 = scalar_select %p920_p10, 1, 0 }
  0x33   : > { %p656_p12 = pnand %p654_p6, %p625_p8  ;;  %p662_p5 = scmp.lt.u32.totalorder %s653_s4, %s1052_s1 }
  0x35   : > { %p657_p0 = pneg %p656_p12  ;;  %p663_p11 = por %p662_p5, %p660_p3 }
  0x37   : > { %p664_p1 = pnand %p663_p11, %p657_p0 }
  0x39   : > { %667 = shalt.err (!%p664_p1)
}
  0x3a   : > { %s668_s8 = scalar_lea.vmem %s179_s27, 64  ;;  %s675_s12 = scalar_lea.vmem %s179_s27, 128 }
  0x3b   : > { %p669_p7 = scmp.ne.s32.totalorder %s179_s27, %s668_s8  ;;  %p676_p9 = scmp.lt.s32.totalorder %s179_s27, %s179_s27 }
  0x3c   : > { %p677_p10 = scmp.lt.s32.totalorder %s675_s12, %s668_s8 }
  0x3d   : > { %p671_p4 = pnand %p669_p7, %p625_p8 }
  0x3e   : > { %p678_p6 = por %p677_p10, %p676_p9 }
  0x3f   : > { %p672_p13 = pneg %p671_p4 }
  0x41   : > { %p679_p12 = pnand %p678_p6, %p672_p13 }
  0x43   : > { %682 = shalt.err (!%p679_p12)
}
  0x44   : > { %526 = dma.hbm_to_vmem [thread:$0]  (!%p888_p2), %s1052_s1, 64, %s179_s27, [#allocation6]  }
  0x45   : > { %p1064_p0 = scmp.ne.s32.totalorder %s1063_s22, 0 }
  0x46   : > { %s189_s20 = sand.u32 (!%p1064_p0), 1, %s778_s13   ;;  %p1065_p8 = scmp.ne.s32.totalorder (!%p1064_p0), %s1057_s21, 0 }
  0x47   : > { %187 = sbr.rel (%p1064_p0) target bundleno = 139 (0x8b), region = 28  ;;  %s503_s23 = sshll.u32 (!%p1064_p0), %s189_s20, 2 }
  0x48   : > { %s190_s30 = scalar_lea.sflag (!%p1064_p0), [#allocation3], %s189_s20  ;;  %s193_s3 = scalar_lea.vmem (!%p1064_p0), [#allocation2], %s503_s23 }
  0x4e   : > { %748 = dma.done.wait (%p1065_p8), %s190_s30, 64  }
  0x4f   : > { %750 = vsyncadd (%p1065_p8), %s190_s30, 4294967232  ;;  %s199_s29 = scalar_lea.sflag [#allocation6], %s189_s20  ;;  %s951_s4 = scalar_lea.vmem [#allocation5], %s503_s23 }
  0x50   : > { %752 = dma.done.wait (%p1065_p8), %s199_s29, 64  }
  0x51   : > { %754 = vsyncadd (%p1065_p8), %s199_s29, 4294967232  ;;  %s225_s22 = sand.u32 1, %s766_s10   ;;  %v238_v0 = vlaneseq  ;;  %v251_v1 = vstv %s782_s14  ;;  %v794_v5 = vmov 0.0   ;;  %v262_v11 = vld [vmem:[%s193_s3] sm:$0xf]  ;;  %s513_s21 = sshll.u32 %s782_s14, 6 }
  0x52   : > { %s505_s27 = sshll.u32 %s225_s22, 2  ;;  %v263_v20 = vadd.f32 1e-12, %v262_v11  ;;  %v289_v28 = vld [vmem:[%s951_s4] sm:$0xf]  ;;  %s993_s8 = scalar_lea.hbm %s1053_s2, %s513_s21 }
  0x53   : > { %vm961_vm0 = vcmp.lt.s32.totalorder %v238_v0, 512  ;;  %v965_v3 = vshrl.u32 %v238_v0, 7  ;;  %v247_v4 = vand.u32 127, %v238_v0  ;;  %s967_s5 = scalar_lea.vmem [#allocation7], %s505_s27  ;;  %v290_v30 = vadd.f32 1e-06, %v289_v28 }
  0x54   : > { %242 = vst.msk [vmem:[%s967_s5] sm:$0xf] %vm961_vm0, %v794_v5  ;;  %v795_v37 = vmov 1966171168   ;;  %s391_s6 = sshll.u32 %s967_s5, 4  ;;  %s377_s12 = scalar_lea.sflag [#allocation4], %s225_s22  ;;  %s995_s6 = int_to_ptr.vmem [resolvable:$true] %s391_s6 }
  0x55   : > { %v248_v6 = vadd.s32 128, %v247_v4  ;;  %v249_v7 = vadd.s32 256, %v247_v4  ;;  %v250_v8 = vadd.s32 384, %v247_v4  ;;  %v252_v9 = vadd.s32 %v251_v1, %v965_v3  ;;  %s683_s17 = scalar_lea.vmem %s995_s6, 64  ;;  %p1068_p10 = scmp.ne.s32.totalorder %s1058_s25, 0 }
  0x56   : > { %v267_v12 = vsub.s32 0, %v965_v3  ;;  %v271_v13 = vsub.s32 1, %v965_v3  ;;  %v275_v14 = vsub.s32 2, %v965_v3  ;;  %v279_v15 = vsub.s32 3, %v965_v3  ;;  %p684_p2 = scmp.ne.s32.totalorder %s995_s6, %s683_s17  ;;  %s796_s14 = smov [#allocation7]  }
  0x57   : > { %v253_v10 = vmul.u32 512, %v252_v9  ;;  %v348_v38 = vunpack.c.l.s4 %v795_v37  ;;  %s687_s18 = sshll.u32 %s796_s14, 4  ;;  %s688_s18 = int_to_ptr.vmem [resolvable:$false] %s687_s18 }
  0x58   : > { %v268_v21 = vrot.slane %v263_v20, %v267_v12  ;;  %v272_v22 = vrot.slane %v263_v20, %v271_v13  ;;  %v276_v23 = vrot.slane %v263_v20, %v275_v14  ;;  %v280_v24 = vrot.slane %v263_v20, %v279_v15  ;;  %p685_p3 = pnand %p684_p2, %p1068_p10  ;;  %s689_s20 = scalar_lea.vmem %s688_s18, 128 }
  0x59   : > { %v254_v16 = vadd.s32 %v253_v10, %v247_v4  ;;  %v255_v17 = vadd.s32 %v253_v10, %v248_v6  ;;  %v256_v18 = vadd.s32 %v253_v10, %v249_v7  ;;  %v257_v19 = vadd.s32 %v253_v10, %v250_v8  ;;  %p690_p11 = scmp.lt.s32.totalorder %s995_s6, %s688_s18  ;;  %p691_p1 = scmp.lt.s32.totalorder %s689_s20, %s683_s17 }
  0x5a   : > { %v295_v31 = vrot.slane %v290_v30, %v267_v12  ;;  %v299_v32 = vrot.slane %v290_v30, %v271_v13  ;;  %v303_v33 = vrot.slane %v290_v30, %v275_v14  ;;  %v307_v34 = vrot.slane %v290_v30, %v279_v15  ;;  %p686_p5 = pneg %p685_p3 }
  0x5b   : > { %vm258_vm1 = vcmp.lt.s32.totalorder %v254_v16, 512  ;;  %vm259_vm2 = vcmp.lt.s32.totalorder %v255_v17, 512  ;;  %vm260_vm3 = vcmp.lt.s32.totalorder %v256_v18, 512  ;;  %vm261_vm4 = vcmp.lt.s32.totalorder %v257_v19, 512  ;;  %v336_v6 = vld [vmem:[%s967_s5] sm:$0xf]  ;;  %p692_p7 = por %p691_p1, %p690_p11 }
  0x5c   : > { %v285_v25 = vsel %vm258_vm1, %v268_v21, 1.0  ;;  %v286_v26 = vsel %vm259_vm2, %v272_v22, 1.0  ;;  %v287_v27 = vsel %vm260_vm3, %v276_v23, 1.0  ;;  %v288_v29 = vsel %vm261_vm4, %v280_v24, 1.0 }
  0x5d   : > { %607 = vrcp.f32 %v285_v25  ;;  %v312_v36 = vsel %vm258_vm1, %v295_v31, 0.0  ;;  %v313_v40 = vsel %vm259_vm2, %v299_v32, 0.0  ;;  %v314_v42 = vsel %vm260_vm3, %v303_v33, 0.0  ;;  %p693_p4 = pnand %p692_p7, %p686_p5 }
  0x5e   : > { %609 = vrcp.f32 %v286_v26  ;;  %v315_v44 = vsel %vm261_vm4, %v307_v34, 0.0  ;;  %v349_v48 = vunpack.c.0.s8 %v348_v38 }
  0x5f   : > { %611 = vrcp.f32 %v287_v27 }
  0x60   : > { %613 = vrcp.f32 %v288_v29  ;;  %v352_v60 = vsub.s32 %v349_v48, %v965_v3 }
  0x61   : > { %615 = vlog2.f32 %v285_v25 }
  0x62   : > { %617 = vlog2.f32 %v286_v26 }
  0x63   : > { %619 = vlog2.f32 %v287_v27 }
  0x64   : > { %621 = vlog2.f32 %v288_v29 }
  0x67   : > { %v608_v35 = vpop.eup %607 }
  0x68   : > { %v610_v39 = vpop.eup %609  ;;  %v317_v45 = vmul.f32 %v608_v35, %v312_v36 }
  0x69   : > { %v612_v41 = vpop.eup %611  ;;  %v319_v47 = vmul.f32 %v610_v39, %v313_v40 }
  0x6a   : > { %v614_v43 = vpop.eup %613  ;;  %v321_v50 = vmul.f32 %v612_v41, %v314_v42 }
  0x6b   : > { %v616_v46 = vpop.eup %615  ;;  %v323_v53 = vmul.f32 %v614_v43, %v315_v44 }
  0x6c   : > { %v618_v49 = vpop.eup %617  ;;  %v325_v51 = vmul.f32 0.6931472, %v616_v46 }
  0x6d   : > { %v620_v52 = vpop.eup %619  ;;  %v327_v54 = vmul.f32 0.6931472, %v618_v49 }
  0x6e   : > { %v622_v55 = vpop.eup %621  ;;  %v329_v56 = vmul.f32 0.6931472, %v620_v52  ;;  %v332_v57 = vadd.f32 %v325_v51, %v317_v45 }
  0x6f   : > { %v331_v58 = vmul.f32 0.6931472, %v622_v55  ;;  %v333_v59 = vadd.f32 %v327_v54, %v319_v47 }
  0x70   : > { %v334_v61 = vadd.f32 %v329_v56, %v321_v50 }
  0x71   : > { %v335_v62 = vadd.f32 %v331_v58, %v323_v53  ;;  %v345_v63 = vcombine.low %v332_v57, %v333_v59 }
  0x73   : > { %v346_v0 = vcombine.low %v334_v61, %v335_v62  ;;  %v353_v1 = vrot.slane %v345_v63, %v352_v60 }
  0x75   : > { %v360_v4 = vrot.slane %v346_v0, %v352_v60 }
  0x77   : > { %v361_v5 = vcombine.low %v353_v1, %v360_v4 }
  0x79   : > { %v368_v7 = vrot.slane %v361_v5, %v352_v60 }
  0x7b   : > { %v370_v8 = vadd.f32 %v368_v7, %v336_v6 }
  0x7d   : > { %375 = vst.msk [vmem:[%s967_s5] sm:$0xf] %vm961_vm0, %v370_v8 }
  0x7e   : > { %696 = shalt.err (!%p693_p4)
}
  0x7f   : > { %s697_s23 = scalar_lea.hbm %s993_s8, 64  ;;  %s701_s29 = scalar_lea.hbm %s1053_s2, 128 }
  0x80   : > { %p698_p13 = scmp.ne.s32.totalorder %s993_s8, %s697_s23  ;;  %p702_p12 = scmp.lt.u32.totalorder %s993_s8, %s1053_s2 }
  0x81   : > { %p703_p0 = scmp.lt.u32.totalorder %s701_s29, %s697_s23  ;;  %p705_p2 = scmp.lt.u32.totalorder %s697_s23, %s993_s8 }
  0x82   : > { %p699_p9 = pnand %p698_p13, %p1068_p10 }
  0x83   : > { %p704_p8 = por %p703_p0, %p702_p12 }
  0x84   : > { %p700_p6 = pneg %p699_p9 }
  0x85   : > { %p706_p3 = por %p705_p2, %p704_p8 }
  0x87   : > { %p707_p5 = pnand %p706_p3, %p700_p6 }
  0x89   : > { %710 = shalt.err (!%p707_p5)
}
  0x8a   : > { %518 = dma.vmem_to_hbm [thread:$0]  (%p1068_p10), %s995_s6, 64, %s993_s8, %s377_s12  }
  0x8b PF: > { %s403_s27 = sand.u32 1, %s762_s9   ;;  %p1069_p11 = scmp.ne.s32.totalorder %s1059_s26, 0 }
  0x8c   : > { %p1070_p1 = scmp.ge.s32.totalorder %s790_s16, 2  ;;  %s404_s5 = scalar_lea.sflag [#allocation4], %s403_s27 }
  0x8e   : > { %p528_p7 = pnand %p1070_p1, %p1069_p11 }
  0x90   : > { %756 = dma.done.wait (!%p528_p7), %s404_s5, 64  }
  0x91   : > { %758 = vsyncadd (!%p528_p7), %s404_s5, 4294967232  ;;  %s21_s16 = sadd.s32 1, %s790_s16   ;;  %s1071_s9 = smov %s766_s10 }
  0x92   : > { %p18_p4 = scmp.ge.s32.totalorder %s21_s16, 4   ;;  %s1072_s10 = smov %s770_s11 }
  0x93   : > { %s1073_s11 = smov %s870_s24  ;;  %s1074_s12 = smov %s778_s13 }
  0x94   : > { %s1041_s13 = smov 0   ;;  %s1075_s14 = smov %s786_s15 }
  0x95   : > { %s1076_s15 = smov %s1078_s19  ;;  %20 = sbr.rel (!%p18_p4) target bundleno = 9 (0x9), region = 90 }
  0x9c   :  { %409 = vsyncpa [#allocation3], 1 }
  0x9d   :  { %411 = vsyncpa [#allocation3 + $0x1], 1 }
  0x9e   :  { %412 = vsyncpa [#allocation6], 1 }
  0x9f   :  { %414 = vsyncpa [#allocation6 + $0x1], 1 }
  0xa0   :  { %415 = vsyncpa [#allocation4], 1 }
  0xa1   :  { %417 = vsyncpa [#allocation4 + $0x1], 1 }

</bundles_post_ra>
